<compile_context>
chip_gen: v7x
topology: tpu7x:2x2x1
jax: 0.10.0
libtpu: 0.0.40
codegen_flags: <defaults>
</compile_context>

<pallas_src>
import functools

import jax
import jax.numpy as jnp
from jax.experimental import pallas as pl
from jax.experimental.pallas import tpu as pltpu


def _sigmoid_via_tanh(x):
    # logistic(x) = 0.5 * (tanh(0.5 * x) + 1): single EUP op + cheap VPU fixup.
    return 0.5 * (jnp.tanh(0.5 * x) + 1.0)


def _convlstm_kernel(wt_ref, pt_ref, ct_ref, hc_ref, *, Ch):
    """Fused conv-as-GEMM + LSTM gate math, channels-on-sublanes layout.

    wt_ref : (4*Ch, Kc_pad)  bf16  transposed conv weights (cols zero-padded)
    pt_ref : (Kc_pad, TM)    bf16  transposed im2col patches (rows zero-padded)
    ct_ref : (Ch, TM)        f32   previous cell state, (channel, position)
    hc_ref : (2*Ch, TM)      f32   fused output: [:Ch] = h, [Ch:] = c
    """
    # Single full-depth MXU matmul, f32 accumulation.  Output (4*Ch, TM) is
    # lane-dense: TM is a multiple of 128.
    gates = jnp.dot(wt_ref[...], pt_ref[...], preferred_element_type=jnp.float32)

    # Gate order matches torch.chunk(gates, 4, dim=1): i, f, o, g.
    # Sublane slices at multiples of Ch (full lane width, no masked access).
    i_g = _sigmoid_via_tanh(gates[0 * Ch:1 * Ch, :])
    f_g = _sigmoid_via_tanh(gates[1 * Ch:2 * Ch, :])
    o_g = _sigmoid_via_tanh(gates[2 * Ch:3 * Ch, :])
    g_g = jnp.tanh(gates[3 * Ch:4 * Ch, :])

    c_prev = ct_ref[...]
    c_new = f_g * c_prev + i_g * g_g
    h_new = o_g * jnp.tanh(c_new)

    # Two dense, sublane-aligned, full-lane-width stores (one output stream).
    hc_ref[0 * Ch:1 * Ch, :] = h_new
    hc_ref[1 * Ch:2 * Ch, :] = c_new


def _round_up(a, b):
    return (a + b - 1) // b * b


def _pick_col_tile(m_pad):
    """Column (lane) tile: multiple of 256 where possible, with >=2 grid steps."""
    for cand in (2048, 1024, 512, 256):
        if m_pad % cand == 0 and m_pad // cand >= 2:
            return cand
    # m_pad == 256: fall back to two 128-lane tiles so the grid still has two
    # steps (DMA/compute overlap; TC sharding on v7x matters more here than
    # full MXU stationary width, since the MXU is not the saturating unit).
    return 128


def conv_lstm_cell(x, h_prev, c_prev, w_hwio):
    """ConvLSTM cell forward (bias=False), TPU-friendly NHWC / HWIO layout.

    x      : (B, H, W, Cin)
    h_prev : (B, H, W, Ch)
    c_prev : (B, H, W, Ch)
    w_hwio : (K, K, Cin+Ch, 4*Ch)
    returns (h, c): h is (B, H, W, Ch) in x.dtype, c is (B, H, W, Ch) in f32.
    """
    B, H, W, Cin = x.shape
    Ch = h_prev.shape[-1]
    K = w_hwio.shape[0]
    p = K // 2
    Ct = Cin + Ch
    M = B * H * W
    Kc = K * K * Ct
    Kc_pad = _round_up(Kc, 128)          # lane/sublane-align the contraction dim
    M_pad = _round_up(M, 256)            # lane-align + room for >=2 grid steps

    # ---- plain-JAX layout glue: transposed bf16 im2col slab + weight matrix --
    # Cast to bf16 *before* building the (9x larger) patch slab.
    combined = jnp.concatenate([x, h_prev], axis=-1).astype(jnp.bfloat16)  # (B,H,W,Ct)
    xpad = jnp.pad(combined, ((0, 0), (p, p), (p, p), (0, 0)))             # (B,Hp,Wp,Ct)
    taps = jnp.stack(
        [xpad[:, kh:kh + H, kw:kw + W, :] for kh in range(K) for kw in range(K)],
        axis=0)                                                            # (K*K,B,H,W,Ct)
    # P_T[(tap, ci), (b, h, w)] — contraction on sublanes, M on lanes.
    p_t = jnp.transpose(taps, (0, 4, 1, 2, 3)).reshape(Kc, M)
    p_t = jnp.pad(p_t, ((0, Kc_pad - Kc), (0, M_pad - M)))                 # (Kc_pad, M_pad)

    # W_T[(out_ch), (tap, ci)] — 4*Ch on sublanes, contraction on lanes.
    w_t = jnp.transpose(w_hwio.reshape(Kc, 4 * Ch), (1, 0))
    w_t = jnp.pad(w_t, ((0, 0), (0, Kc_pad - Kc))).astype(jnp.bfloat16)    # (4*Ch, Kc_pad)

    # c_prev as (Ch, M_pad), f32 (cell state stays f32).
    c_t = jnp.transpose(c_prev, (3, 0, 1, 2)).reshape(Ch, M).astype(jnp.float32)
    c_t = jnp.pad(c_t, ((0, 0), (0, M_pad - M)))

    TM = _pick_col_tile(M_pad)
    grid = (M_pad // TM,)

    kernel = functools.partial(_convlstm_kernel, Ch=Ch)

    hc = pl.pallas_call(
        kernel,
        out_shape=jax.ShapeDtypeStruct((2 * Ch, M_pad), jnp.float32),
        grid=grid,
        in_specs=[
            pl.BlockSpec((4 * Ch, Kc_pad), lambda m: (0, 0)),   # weights (resident)
            pl.BlockSpec((Kc_pad, TM), lambda m: (0, m)),       # im2col patches
            pl.BlockSpec((Ch, TM), lambda m: (0, m)),           # c_prev
        ],
        out_specs=pl.BlockSpec((2 * Ch, TM), lambda m: (0, m)),
        compiler_params=pltpu.CompilerParams(
            dimension_semantics=("parallel",),
        ),
    )(w_t, p_t, c_t)

    # Split / un-transpose back to NHWC outside the pallas_call.
    h_t = hc[0 * Ch:1 * Ch, :M]                                            # (Ch, M)
    c_new_t = hc[1 * Ch:2 * Ch, :M]                                        # (Ch, M)
    h = jnp.transpose(h_t.reshape(Ch, B, H, W), (1, 2, 3, 0)).astype(x.dtype)
    c = jnp.transpose(c_new_t.reshape(Ch, B, H, W), (1, 2, 3, 0))          # f32
    return h, c


if __name__ == "__main__":
    B, Cin, H, W = 2, 4, 16, 16
    Ch, K = 32, 3

    key = jax.random.PRNGKey(0)
    k1, k2, k3, k4 = jax.random.split(key, 4)

    # Deterministic synthetic inputs in the module's NCHW / OIHW conventions,
    # converted to the kernel's NHWC / HWIO layout (layout glue only).
    x_nchw = jax.random.normal(k1, (B, Cin, H, W), jnp.float32)
    h_nchw = jax.random.normal(k2, (B, Ch, H, W), jnp.float32)
    c_nchw = jax.random.normal(k3, (B, Ch, H, W), jnp.float32)
    w_oihw = 0.05 * jax.random.normal(k4, (4 * Ch, Cin + Ch, K, K), jnp.float32)

    x = jnp.transpose(x_nchw, (0, 2, 3, 1))
    h_prev = jnp.transpose(h_nchw, (0, 2, 3, 1))
    c_prev = jnp.transpose(c_nchw, (0, 2, 3, 1))
    w_hwio = jnp.transpose(w_oihw, (2, 3, 1, 0))

    h_out, c_out = jax.block_until_ready(
        jax.jit(conv_lstm_cell)(x, h_prev, c_prev, w_hwio)
    )

    combined = jnp.concatenate([x, h_prev], axis=-1)

    # Reference 1 (tight): module semantics with the same bf16 operand rounding
    # the kernel uses on the MXU (f32 accumulation).
    gates_bf = jax.lax.conv_general_dilated(
        combined.astype(jnp.bfloat16), w_hwio.astype(jnp.bfloat16), (1, 1),
        "SAME", dimension_numbers=("NHWC", "HWIO", "NHWC"),
        preferred_element_type=jnp.float32)
    i_g, f_g, o_g, g_g = jnp.split(gates_bf, 4, axis=-1)
    c_ref = jax.nn.sigmoid(f_g) * c_prev + jax.nn.sigmoid(i_g) * jnp.tanh(g_g)
    h_ref = jax.nn.sigmoid(o_g) * jnp.tanh(c_ref)
    assert jnp.allclose(c_out, c_ref, atol=2e-3, rtol=2e-3), "cell state mismatch"
    assert jnp.allclose(h_out, h_ref, atol=2e-3, rtol=2e-3), "hidden state mismatch"

    # Reference 2 (loose sanity): pure f32 module semantics; deviation is bounded
    # by the bf16 MXU-operand rounding (intentional, documented).
    gates_f32 = jax.lax.conv_general_dilated(
        combined, w_hwio, (1, 1), "SAME",
        dimension_numbers=("NHWC", "HWIO", "NHWC"))
    i_g, f_g, o_g, g_g = jnp.split(gates_f32, 4, axis=-1)
    c_ref32 = jax.nn.sigmoid(f_g) * c_prev + jax.nn.sigmoid(i_g) * jnp.tanh(g_g)
    h_ref32 = jax.nn.sigmoid(o_g) * jnp.tanh(c_ref32)
    assert jnp.allclose(c_out, c_ref32, atol=1e-1, rtol=1e-1), "cell state far from f32 ref"
    assert jnp.allclose(h_out, h_ref32, atol=1e-1, rtol=1e-1), "hidden state far from f32 ref"

    print("KERNEL_OK")
</pallas_src>

<mosaic_0001>
module attributes {stable_mosaic.version = 11 : i64} {
  func.func @_convlstm_kernel(%arg0: i32, %arg1: memref<128x384xbf16, #tpu.memory_space<vmem>>, %arg2: memref<384x256xbf16, #tpu.memory_space<vmem>>, %arg3: memref<32x256xf32, #tpu.memory_space<vmem>>, %arg4: memref<64x256xf32, #tpu.memory_space<vmem>>) attributes {dimension_semantics = [#tpu.dimension_semantics<parallel>], iteration_bounds = array<i64: 2>, scalar_prefetch = 0 : i64, scratch_operands = 0 : i64, tpu.core_type = #tpu.core_type<tc>, window_params = [{pipeline_mode = #tpu.pipeline_mode<synchronous>, transform_indices = @transform_0, window_bounds = array<i64: 128, 384>}, {transform_indices = @transform_1, window_bounds = array<i64: 384, 256>}, {transform_indices = @transform_2, window_bounds = array<i64: 32, 256>}, {transform_indices = @transform_3, window_bounds = array<i64: 64, 256>}]} {
    %c0 = arith.constant 0 : index
    %c0_0 = arith.constant 0 : index
    %0 = vector.load %arg1[%c0, %c0_0] : memref<128x384xbf16, #tpu.memory_space<vmem>>, vector<128x384xbf16>
    %c0_1 = arith.constant 0 : index
    %c0_2 = arith.constant 0 : index
    %1 = vector.load %arg2[%c0_1, %c0_2] : memref<384x256xbf16, #tpu.memory_space<vmem>>, vector<384x256xbf16>
    %cst = arith.constant dense<0.000000e+00> : vector<128x256xf32>
    %2 = tpu.matmul %0, %1, %cst {dimension_numbers = #tpu.dot_dimension_numbers<[1], [0], [0], [1], [0, 0, 1, 1], [], []>} : vector<128x384xbf16>, vector<384x256xbf16>, vector<128x256xf32> -> vector<128x256xf32>
    %3 = vector.extract_strided_slice %2 {offsets = [0, 0], sizes = [32, 256], strides = [1, 1]} : vector<128x256xf32> to vector<32x256xf32>
    %cst_3 = arith.constant 5.000000e-01 : f32
    %4 = vector.broadcast %cst_3 : f32 to vector<32x256xf32>
    %5 = arith.mulf %4, %3 : vector<32x256xf32>
    %6 = math.tanh %5 : vector<32x256xf32>
    %cst_4 = arith.constant 1.000000e+00 : f32
    %7 = vector.broadcast %cst_4 : f32 to vector<32x256xf32>
    %8 = arith.addf %6, %7 : vector<32x256xf32>
    %cst_5 = arith.constant 5.000000e-01 : f32
    %9 = vector.broadcast %cst_5 : f32 to vector<32x256xf32>
    %10 = arith.mulf %9, %8 : vector<32x256xf32>
    %11 = vector.extract_strided_slice %2 {offsets = [32, 0], sizes = [32, 256], strides = [1, 1]} : vector<128x256xf32> to vector<32x256xf32>
    %cst_6 = arith.constant 5.000000e-01 : f32
    %12 = vector.broadcast %cst_6 : f32 to vector<32x256xf32>
    %13 = arith.mulf %12, %11 : vector<32x256xf32>
    %14 = math.tanh %13 : vector<32x256xf32>
    %cst_7 = arith.constant 1.000000e+00 : f32
    %15 = vector.broadcast %cst_7 : f32 to vector<32x256xf32>
    %16 = arith.addf %14, %15 : vector<32x256xf32>
    %cst_8 = arith.constant 5.000000e-01 : f32
    %17 = vector.broadcast %cst_8 : f32 to vector<32x256xf32>
    %18 = arith.mulf %17, %16 : vector<32x256xf32>
    %19 = vector.extract_strided_slice %2 {offsets = [64, 0], sizes = [32, 256], strides = [1, 1]} : vector<128x256xf32> to vector<32x256xf32>
    %cst_9 = arith.constant 5.000000e-01 : f32
    %20 = vector.broadcast %cst_9 : f32 to vector<32x256xf32>
    %21 = arith.mulf %20, %19 : vector<32x256xf32>
    %22 = math.tanh %21 : vector<32x256xf32>
    %cst_10 = arith.constant 1.000000e+00 : f32
    %23 = vector.broadcast %cst_10 : f32 to vector<32x256xf32>
    %24 = arith.addf %22, %23 : vector<32x256xf32>
    %cst_11 = arith.constant 5.000000e-01 : f32
    %25 = vector.broadcast %cst_11 : f32 to vector<32x256xf32>
    %26 = arith.mulf %25, %24 : vector<32x256xf32>
    %27 = vector.extract_strided_slice %2 {offsets = [96, 0], sizes = [32, 256], strides = [1, 1]} : vector<128x256xf32> to vector<32x256xf32>
    %28 = math.tanh %27 : vector<32x256xf32>
    %c0_12 = arith.constant 0 : index
    %c0_13 = arith.constant 0 : index
    %29 = vector.load %arg3[%c0_12, %c0_13] : memref<32x256xf32, #tpu.memory_space<vmem>>, vector<32x256xf32>
    %30 = arith.mulf %18, %29 : vector<32x256xf32>
    %31 = arith.mulf %10, %28 : vector<32x256xf32>
    %32 = arith.addf %30, %31 : vector<32x256xf32>
    %33 = math.tanh %32 : vector<32x256xf32>
    %34 = arith.mulf %26, %33 : vector<32x256xf32>
    %c0_14 = arith.constant 0 : index
    %c0_15 = arith.constant 0 : index
    %35 = vector.load %arg4[%c0_14, %c0_15] : memref<64x256xf32, #tpu.memory_space<vmem>>, vector<32x256xf32>
    tpu.vector_store %arg4[%c0_14, %c0_15], %34 {strides = array<i32>} : memref<64x256xf32, #tpu.memory_space<vmem>>, vector<32x256xf32>,
    %c32 = arith.constant 32 : index
    %c0_16 = arith.constant 0 : index
    %36 = vector.load %arg4[%c32, %c0_16] : memref<64x256xf32, #tpu.memory_space<vmem>>, vector<32x256xf32>
    tpu.vector_store %arg4[%c32, %c0_16], %32 {strides = array<i32>} : memref<64x256xf32, #tpu.memory_space<vmem>>, vector<32x256xf32>,
    return
  }
  func.func @transform_0(%arg0: i32) -> (i32, i32) {
    %c0_i32 = arith.constant 0 : i32
    %c0_i32_0 = arith.constant 0 : i32
    %c0_i32_1 = arith.constant 0 : i32
    return %c0_i32, %c0_i32_0 : i32, i32
  }
  func.func @transform_1(%arg0: i32) -> (i32, i32) {
    %c0_i32 = arith.constant 0 : i32
    %c0_i32_0 = arith.constant 0 : i32
    return %c0_i32, %arg0 : i32, i32
  }
  func.func @transform_2(%arg0: i32) -> (i32, i32) {
    %c0_i32 = arith.constant 0 : i32
    %c0_i32_0 = arith.constant 0 : i32
    return %c0_i32, %arg0 : i32, i32
  }
  func.func @transform_3(%arg0: i32) -> (i32, i32) {
    %c0_i32 = arith.constant 0 : i32
    %c0_i32_0 = arith.constant 0 : i32
    return %c0_i32, %arg0 : i32, i32
  }
}

</mosaic_0001>

<bundles_post_ra>
// kernel: conv_lstm_cell.1
= control target key start
LH: loop header
LB: loop body
LE: loop exit
PB: predicated region body
PF: predicated region fallthrough
CT: control target
= control target key end

     0   :  { %s1799_s12 = smov 0   ;;  %s1801_s13 = smov 0   ;;  %s2203_s0 = inlined_call_operand.vmem [shape: bf16[128,384], index: 0, kind: input, shape index: {}]   ;;  %s2204_s1 = inlined_call_operand.vmem [shape: bf16[384,512], index: 1, kind: input, shape index: {}]   ;;  %s2205_s2 = inlined_call_operand.vmem [shape: f32[32,512], index: 2, kind: input, shape index: {}]   ;;  %s2206_s3 = inlined_call_operand.vmem [shape: f32[64,512], index: 3, kind: output, shape index: {}]  }
   0x1   :  { %s1803_s14 = smov 0  }
   0x2 LB: > { %s1419_s15 = sadd.s32 4294967295, %s1776_s14   ;;  %s1816_s16 = sadd.s32 1, %s1776_s14   ;;  %s1776_s14 = sphi %s1803_s14, %s2211_s14   ;;  %s1772_s13 = sphi %s1801_s13, %s2210_s13   ;;  %s1768_s12 = sphi %s1799_s12, %s2209_s12  }
   0x3   : > { %s38_s17 = ssub.s32 %s1776_s14, %s1816_s16  ;;  %s41_s18 = sadd.s32 1, %s1772_s13 }
   0x4   : > { %p39_p0 = scmp.eq.s32.totalorder %s38_s17, 0  ;;  %p48_p1 = scmp.ne.s32.totalorder %s1772_s13, %s1768_s12 }
   0x5   : > { %p49_p2 = scmp.eq.s32.totalorder %s1776_s14, 0  ;;  %p104_p3 = scmp.eq.s32.totalorder %s1419_s15, 1 }
   0x6   : > { %s1827_s19 = scalar_select %p39_p0, %s1772_s13, %s41_s18  }
   0x7   : > { %p1829_p4 = por %p49_p2, %p48_p1  ;;  %p1833_p5 = por %p104_p3, %p48_p1 }
   0x8   : > { %p1422_p6 = scmp.ge.s32.totalorder %s1776_s14, 2 }
   0xa   : > { %129 = sbr.rel (%p1422_p6) target bundleno = 53 (0x35), region = 20 }
  0x11   : > { %132 = sbr.rel (!%p1829_p4) target bundleno = 45 (0x2d), region = 24  ;;  %s134_s22 = sand.u32 (%p1829_p4), 1, %s1772_s13  }
  0x12   : > { %s1508_s23 = sshll.u32 (%p1829_p4), %s1776_s14, 3  ;;  %s1543_s24 = smul.u32 (%p1829_p4), 384, %s134_s22 }
  0x13   : > { %s1845_s27 = scalar_lea.vmem (%p1829_p4), %s2204_s1, %s1508_s23 }
  0x14   : > { %v261_v0 = vld [vmem:[%s1845_s27] sm:$0xff] (%p1829_p4)  ;;  %v263_v1 = vld [vmem:[%s1845_s27 + $0x10] sm:$0xff] (%p1829_p4)  ;;  %s1853_s28 = scalar_lea.vmem (%p1829_p4), [#allocation2], %s1543_s24 }
  0x15   : > { %v265_v2 = vld [vmem:[%s1845_s27 + $0x20] sm:$0xff] (%p1829_p4)  ;;  %v267_v3 = vld [vmem:[%s1845_s27 + $0x30] sm:$0xff] (%p1829_p4)  ;;  %262 = vst [vmem:[%s1853_s28] sm:$0xff] (%p1829_p4), %v261_v0  ;;  %264 = vst [vmem:[%s1853_s28 + $0x8] sm:$0xff] (%p1829_p4), %v263_v1 }
  0x16   : > { %v269_v4 = vld [vmem:[%s1845_s27 + $0x40] sm:$0xff] (%p1829_p4)  ;;  %v271_v5 = vld [vmem:[%s1845_s27 + $0x50] sm:$0xff] (%p1829_p4)  ;;  %266 = vst [vmem:[%s1853_s28 + $0x10] sm:$0xff] (%p1829_p4), %v265_v2  ;;  %268 = vst [vmem:[%s1853_s28 + $0x18] sm:$0xff] (%p1829_p4), %v267_v3 }
  0x17   : > { %270 = vst [vmem:[%s1853_s28 + $0x20] sm:$0xff] (%p1829_p4), %v269_v4  ;;  %272 = vst [vmem:[%s1853_s28 + $0x28] sm:$0xff] (%p1829_p4), %v271_v5  ;;  %v273_v6 = vld [vmem:[%s1845_s27 + $0x60] sm:$0xff] (%p1829_p4)  ;;  %v275_v7 = vld [vmem:[%s1845_s27 + $0x70] sm:$0xff] (%p1829_p4) }
  0x18   : > { %v277_v8 = vld [vmem:[%s1845_s27 + $0x80] sm:$0xff]  ;;  %274 = vst [vmem:[%s1853_s28 + $0x30] sm:$0xff] %v273_v6  ;;  %276 = vst [vmem:[%s1853_s28 + $0x38] sm:$0xff] %v275_v7  ;;  %v279_v9 = vld [vmem:[%s1845_s27 + $0x90] sm:$0xff] }
  0x19   : > { %278 = vst [vmem:[%s1853_s28 + $0x40] sm:$0xff] %v277_v8  ;;  %v281_v10 = vld [vmem:[%s1845_s27 + $0xa0] sm:$0xff]  ;;  %v283_v11 = vld [vmem:[%s1845_s27 + $0xb0] sm:$0xff]  ;;  %280 = vst [vmem:[%s1853_s28 + $0x48] sm:$0xff] %v279_v9 }
  0x1a   : > { %282 = vst [vmem:[%s1853_s28 + $0x50] sm:$0xff] %v281_v10  ;;  %284 = vst [vmem:[%s1853_s28 + $0x58] sm:$0xff] %v283_v11  ;;  %v285_v12 = vld [vmem:[%s1845_s27 + $0xc0] sm:$0xff]  ;;  %v287_v13 = vld [vmem:[%s1845_s27 + $0xd0] sm:$0xff] }
  0x1b   : > { %v289_v14 = vld [vmem:[%s1845_s27 + $0xe0] sm:$0xff]  ;;  %286 = vst [vmem:[%s1853_s28 + $0x60] sm:$0xff] %v285_v12  ;;  %288 = vst [vmem:[%s1853_s28 + $0x68] sm:$0xff] %v287_v13  ;;  %v291_v15 = vld [vmem:[%s1845_s27 + $0xf0] sm:$0xff] }
  0x1c   : > { %290 = vst [vmem:[%s1853_s28 + $0x70] sm:$0xff] %v289_v14  ;;  %v293_v16 = vld [vmem:[%s1845_s27 + $0x100] sm:$0xff]  ;;  %v295_v17 = vld [vmem:[%s1845_s27 + $0x110] sm:$0xff]  ;;  %292 = vst [vmem:[%s1853_s28 + $0x78] sm:$0xff] %v291_v15 }
  0x1d   : > { %294 = vst [vmem:[%s1853_s28 + $0x80] sm:$0xff] %v293_v16  ;;  %296 = vst [vmem:[%s1853_s28 + $0x88] sm:$0xff] %v295_v17  ;;  %v297_v18 = vld [vmem:[%s1845_s27 + $0x120] sm:$0xff]  ;;  %v299_v19 = vld [vmem:[%s1845_s27 + $0x130] sm:$0xff] }
  0x1e   : > { %v301_v20 = vld [vmem:[%s1845_s27 + $0x140] sm:$0xff]  ;;  %298 = vst [vmem:[%s1853_s28 + $0x90] sm:$0xff] %v297_v18  ;;  %300 = vst [vmem:[%s1853_s28 + $0x98] sm:$0xff] %v299_v19  ;;  %v303_v21 = vld [vmem:[%s1845_s27 + $0x150] sm:$0xff] }
  0x1f   : > { %302 = vst [vmem:[%s1853_s28 + $0xa0] sm:$0xff] %v301_v20  ;;  %v305_v22 = vld [vmem:[%s1845_s27 + $0x160] sm:$0xff]  ;;  %v307_v23 = vld [vmem:[%s1845_s27 + $0x170] sm:$0xff]  ;;  %304 = vst [vmem:[%s1853_s28 + $0xa8] sm:$0xff] %v303_v21 }
  0x20   : > { %306 = vst [vmem:[%s1853_s28 + $0xb0] sm:$0xff] %v305_v22  ;;  %308 = vst [vmem:[%s1853_s28 + $0xb8] sm:$0xff] %v307_v23  ;;  %v309_v24 = vld [vmem:[%s1845_s27 + $0x180] sm:$0xff]  ;;  %v311_v25 = vld [vmem:[%s1845_s27 + $0x190] sm:$0xff] }
  0x21   : > { %v313_v26 = vld [vmem:[%s1845_s27 + $0x1a0] sm:$0xff]  ;;  %310 = vst [vmem:[%s1853_s28 + $0xc0] sm:$0xff] %v309_v24  ;;  %312 = vst [vmem:[%s1853_s28 + $0xc8] sm:$0xff] %v311_v25  ;;  %v315_v27 = vld [vmem:[%s1845_s27 + $0x1b0] sm:$0xff] }
  0x22   : > { %314 = vst [vmem:[%s1853_s28 + $0xd0] sm:$0xff] %v313_v26  ;;  %v317_v28 = vld [vmem:[%s1845_s27 + $0x1c0] sm:$0xff]  ;;  %v319_v29 = vld [vmem:[%s1845_s27 + $0x1d0] sm:$0xff]  ;;  %316 = vst [vmem:[%s1853_s28 + $0xd8] sm:$0xff] %v315_v27 }
  0x23   : > { %318 = vst [vmem:[%s1853_s28 + $0xe0] sm:$0xff] %v317_v28  ;;  %320 = vst [vmem:[%s1853_s28 + $0xe8] sm:$0xff] %v319_v29  ;;  %v321_v30 = vld [vmem:[%s1845_s27 + $0x1e0] sm:$0xff]  ;;  %v323_v31 = vld [vmem:[%s1845_s27 + $0x1f0] sm:$0xff] }
  0x24   : > { %v325_v32 = vld [vmem:[%s1845_s27 + $0x200] sm:$0xff]  ;;  %322 = vst [vmem:[%s1853_s28 + $0xf0] sm:$0xff] %v321_v30  ;;  %324 = vst [vmem:[%s1853_s28 + $0xf8] sm:$0xff] %v323_v31  ;;  %v327_v33 = vld [vmem:[%s1845_s27 + $0x210] sm:$0xff] }
  0x25   : > { %326 = vst [vmem:[%s1853_s28 + $0x100] sm:$0xff] %v325_v32  ;;  %v329_v34 = vld [vmem:[%s1845_s27 + $0x220] sm:$0xff]  ;;  %v331_v35 = vld [vmem:[%s1845_s27 + $0x230] sm:$0xff]  ;;  %328 = vst [vmem:[%s1853_s28 + $0x108] sm:$0xff] %v327_v33 }
  0x26   : > { %330 = vst [vmem:[%s1853_s28 + $0x110] sm:$0xff] %v329_v34  ;;  %332 = vst [vmem:[%s1853_s28 + $0x118] sm:$0xff] %v331_v35  ;;  %v333_v36 = vld [vmem:[%s1845_s27 + $0x240] sm:$0xff]  ;;  %v335_v37 = vld [vmem:[%s1845_s27 + $0x250] sm:$0xff] }
  0x27   : > { %v337_v38 = vld [vmem:[%s1845_s27 + $0x260] sm:$0xff]  ;;  %334 = vst [vmem:[%s1853_s28 + $0x120] sm:$0xff] %v333_v36  ;;  %336 = vst [vmem:[%s1853_s28 + $0x128] sm:$0xff] %v335_v37  ;;  %v339_v39 = vld [vmem:[%s1845_s27 + $0x270] sm:$0xff] }
  0x28   : > { %338 = vst [vmem:[%s1853_s28 + $0x130] sm:$0xff] %v337_v38  ;;  %v341_v40 = vld [vmem:[%s1845_s27 + $0x280] sm:$0xff]  ;;  %v343_v41 = vld [vmem:[%s1845_s27 + $0x290] sm:$0xff]  ;;  %340 = vst [vmem:[%s1853_s28 + $0x138] sm:$0xff] %v339_v39 }
  0x29   : > { %342 = vst [vmem:[%s1853_s28 + $0x140] sm:$0xff] %v341_v40  ;;  %344 = vst [vmem:[%s1853_s28 + $0x148] sm:$0xff] %v343_v41  ;;  %v345_v42 = vld [vmem:[%s1845_s27 + $0x2a0] sm:$0xff]  ;;  %v347_v43 = vld [vmem:[%s1845_s27 + $0x2b0] sm:$0xff] }
  0x2a   : > { %v349_v44 = vld [vmem:[%s1845_s27 + $0x2c0] sm:$0xff]  ;;  %346 = vst [vmem:[%s1853_s28 + $0x150] sm:$0xff] %v345_v42  ;;  %348 = vst [vmem:[%s1853_s28 + $0x158] sm:$0xff] %v347_v43  ;;  %v351_v45 = vld [vmem:[%s1845_s27 + $0x2d0] sm:$0xff] }
  0x2b   : > { %350 = vst [vmem:[%s1853_s28 + $0x160] sm:$0xff] %v349_v44  ;;  %v353_v46 = vld [vmem:[%s1845_s27 + $0x2e0] sm:$0xff]  ;;  %v355_v47 = vld [vmem:[%s1845_s27 + $0x2f0] sm:$0xff]  ;;  %352 = vst [vmem:[%s1853_s28 + $0x168] sm:$0xff] %v351_v45 }
  0x2c   : > { %354 = vst [vmem:[%s1853_s28 + $0x170] sm:$0xff] %v353_v46  ;;  %356 = vst [vmem:[%s1853_s28 + $0x178] sm:$0xff] %v355_v47 }
  0x2d PF: > { %362 = sbr.rel (!%p1829_p4) target bundleno = 53 (0x35), region = 62  ;;  %s364_s29 = sand.u32 (%p1829_p4), 1, %s1772_s13  }
  0x2e   : > { %s1509_s30 = sshll.u32 (%p1829_p4), %s1776_s14, 4  ;;  %s1425_s4 = sshll.u32 (%p1829_p4), %s364_s29, 6 }
  0x2f   : > { %s369_s7 = scalar_lea.vmem (%p1829_p4), %s2205_s2, %s1509_s30  ;;  %s366_s8 = scalar_lea.vmem (%p1829_p4), [#allocation3], %s1425_s4 }
  0x30   : > { %v382_v48 = vld [vmem:[%s369_s7] sm:$0xff] (%p1829_p4)  ;;  %v384_v49 = vld [vmem:[%s369_s7 + $0x8] sm:$0xff] (%p1829_p4) }
  0x31   : > { %v386_v50 = vld [vmem:[%s369_s7 + $0x20] sm:$0xff] (%p1829_p4)  ;;  %383 = vst [vmem:[%s366_s8] sm:$0xff] (%p1829_p4), %v382_v48  ;;  %385 = vst [vmem:[%s366_s8 + $0x8] sm:$0xff] (%p1829_p4), %v384_v49  ;;  %v388_v51 = vld [vmem:[%s369_s7 + $0x28] sm:$0xff] (%p1829_p4) }
  0x32   : > { %387 = vst [vmem:[%s366_s8 + $0x10] sm:$0xff] (%p1829_p4), %v386_v50  ;;  %v390_v52 = vld [vmem:[%s369_s7 + $0x40] sm:$0xff] (%p1829_p4)  ;;  %v392_v53 = vld [vmem:[%s369_s7 + $0x48] sm:$0xff] (%p1829_p4)  ;;  %389 = vst [vmem:[%s366_s8 + $0x18] sm:$0xff] (%p1829_p4), %v388_v51 }
  0x33   : > { %391 = vst [vmem:[%s366_s8 + $0x20] sm:$0xff] (%p1829_p4), %v390_v52  ;;  %393 = vst [vmem:[%s366_s8 + $0x28] sm:$0xff] (%p1829_p4), %v392_v53  ;;  %v394_v54 = vld [vmem:[%s369_s7 + $0x60] sm:$0xff] (%p1829_p4)  ;;  %v396_v55 = vld [vmem:[%s369_s7 + $0x68] sm:$0xff] (%p1829_p4) }
  0x34   : > { %395 = vst [vmem:[%s366_s8 + $0x30] sm:$0xff] %v394_v54  ;;  %397 = vst [vmem:[%s366_s8 + $0x38] sm:$0xff] %v396_v55 }
  0x35 PF: > { %p1428_p7 = scmp.ge.s32.totalorder %s1776_s14, 1  ;;  %p402_p8 = scmp.lt.s32.totalorder %s1776_s14, 3 }
  0x37   : > { %p403_p9 = pnand %p1428_p7, %p402_p8 }
  0x38   : > { %s1955_s9 = sand.u32 (!%p403_p9), 1, %s1768_s12   ;;  %v1778_v56 = vmov (!%p403_p9), 0   ;;  %v1645_v57 = vld [vmem:[%s2203_s0 + $0x4] ss:$12 sps:$4 sm:$0xff] (!%p403_p9)   ;;  %v1642_v33 = vld [vmem:[%s2203_s0 + $0x8] ss:$12 sps:$4 sm:$0xff] (!%p403_p9)  }
  0x39   : > { %406 = sbr.rel (%p403_p9) target bundleno = 436 (0x1b4), region = 85  ;;  %1039 = vmatprep.mubr.bf16.mxu0 (!%p403_p9), %v1778_v56  ;;  %926 = vmatprep.mubr.bf16.mxu1 (!%p403_p9), %v1645_v57  ;;  %v1646_v38 = vld [vmem:[%s2203_s0 + $0x20] ss:$12 sps:$4 sm:$0xff] (!%p403_p9)   ;;  %v1650_v43 = vld [vmem:[%s2203_s0 + $0x38] ss:$12 sps:$4 sm:$0xff] (!%p403_p9)   ;;  %s1429_s26 = sshll.u32 (!%p403_p9), %s1955_s9, 6 }
  0x3a   : > { %s1544_s10 = smul.u32 (!%p403_p9), 384, %s1955_s9  ;;  %v1643_v45 = vld [vmem:[%s2203_s0] ss:$12 sps:$4 sm:$0xff] (!%p403_p9)   ;;  %v1647_v46 = vld [vmem:[%s2203_s0 + $0x1c] ss:$12 sps:$4 sm:$0xff] (!%p403_p9)   ;;  %s2128_s27 = scalar_lea.vmem (!%p403_p9), [#allocation3], %s1429_s26 }
  0x3b   : > { %v1654_v47 = vld [vmem:[%s2203_s0 + $0x50] ss:$12 sps:$4 sm:$0xff] (!%p403_p9)   ;;  %v1649_v48 = vld [vmem:[%s2203_s0 + $0x18] ss:$12 sps:$4 sm:$0xff] (!%p403_p9)   ;;  %v1651_v49 = vld [vmem:[%s2203_s0 + $0x34] ss:$12 sps:$4 sm:$0xff] (!%p403_p9)  }
  0x3c   : > { %s1962_s18 = scalar_lea.vmem (!%p403_p9), [#allocation2], %s1544_s10  ;;  %v1658_v50 = vld [vmem:[%s2203_s0 + $0x68] ss:$12 sps:$4 sm:$0xff] (!%p403_p9)   ;;  %v1653_v51 = vld [vmem:[%s2203_s0 + $0x30] ss:$12 sps:$4 sm:$0xff] (!%p403_p9)   ;;  %s1430_s28 = sshll.u32 (!%p403_p9), %s1955_s9, 7 }
  0x3d   : > { %v1570_v58 = vld [vmem:[%s1962_s18 + $0x4] ss:$8 sps:$4 sm:$0xff] (!%p403_p9)   ;;  %v1572_v59 = vld [vmem:[%s1962_s18] ss:$8 sps:$4 sm:$0xff] (!%p403_p9)   ;;  %v1573_v60 = vld [vmem:[%s1962_s18 + $0x14] ss:$8 sps:$4 sm:$0xff] (!%p403_p9)  }
  0x3e   : > { %894 = vmatprep.subr.bf16.mxu1 (!%p403_p9), %v1570_v58  ;;  %v1575_v61 = vld [vmem:[%s1962_s18 + $0x10] ss:$8 sps:$4 sm:$0xff] (!%p403_p9)   ;;  %v1576_v62 = vld [vmem:[%s1962_s18 + $0x24] ss:$8 sps:$4 sm:$0xff] (!%p403_p9)   ;;  %v1578_v63 = vld [vmem:[%s1962_s18 + $0x20] ss:$8 sps:$4 sm:$0xff] (!%p403_p9)  }
  0x3f   : > { %895 = vmatpush1.bf16.msra.mxu1 (!%p403_p9), %v1572_v59  ;;  %v1579_v0 = vld [vmem:[%s1962_s18 + $0x34] ss:$8 sps:$4 sm:$0xff] (!%p403_p9)   ;;  %v1581_v1 = vld [vmem:[%s1962_s18 + $0x30] ss:$8 sps:$4 sm:$0xff] (!%p403_p9)   ;;  %v1594_v2 = vld [vmem:[%s1962_s18 + $0x104] ss:$8 sps:$4 sm:$0xff] (!%p403_p9)  }
  0x40   : > { %896 = vmatprep.subr.bf16.mxu1 %v1573_v60  ;;  %v1596_v3 = vld [vmem:[%s1962_s18 + $0x100] ss:$8 sps:$4 sm:$0xff]   ;;  %v1582_v4 = vld [vmem:[%s1962_s18 + $0x44] ss:$8 sps:$4 sm:$0xff]   ;;  %1007 = vmatprep.subr.bf16.mxu0 %v1594_v2  ;;  %v1600_v5 = vld [vmem:[%s1962_s18 + $0x114] ss:$8 sps:$4 sm:$0xff]  }
  0x41   : > { %1008 = vmatpush1.bf16.msra.mxu0 %v1596_v3  ;;  %v1602_v6 = vld [vmem:[%s1962_s18 + $0x110] ss:$8 sps:$4 sm:$0xff]   ;;  %v1584_v7 = vld [vmem:[%s1962_s18 + $0x40] ss:$8 sps:$4 sm:$0xff]   ;;  %v1585_v8 = vld [vmem:[%s1962_s18 + $0x54] ss:$8 sps:$4 sm:$0xff]  }
  0x42   : > { %1009 = vmatprep.subr.bf16.mxu0 %v1600_v5  ;;  %v1606_v9 = vld [vmem:[%s1962_s18 + $0x124] ss:$8 sps:$4 sm:$0xff]   ;;  %v1608_v10 = vld [vmem:[%s1962_s18 + $0x120] ss:$8 sps:$4 sm:$0xff]   ;;  %v1587_v11 = vld [vmem:[%s1962_s18 + $0x50] ss:$8 sps:$4 sm:$0xff]  }
  0x43   : > { %897 = vmatpush1.bf16.msra.mxu1 %v1575_v61  ;;  %v1612_v12 = vld [vmem:[%s1962_s18 + $0x134] ss:$8 sps:$4 sm:$0xff]   ;;  %v1588_v13 = vld [vmem:[%s1962_s18 + $0x64] ss:$8 sps:$4 sm:$0xff]   ;;  %v1614_v14 = vld [vmem:[%s1962_s18 + $0x130] ss:$8 sps:$4 sm:$0xff]  }
  0x44   : > { %898 = vmatprep.subr.bf16.mxu1 %v1576_v62  ;;  %v1590_v15 = vld [vmem:[%s1962_s18 + $0x60] ss:$8 sps:$4 sm:$0xff]   ;;  %v1618_v16 = vld [vmem:[%s1962_s18 + $0x144] ss:$8 sps:$4 sm:$0xff]   ;;  %v1591_v17 = vld [vmem:[%s1962_s18 + $0x74] ss:$8 sps:$4 sm:$0xff]  }
  0x45   : > { %1010 = vmatpush1.bf16.msra.mxu0 %v1602_v6  ;;  %v1620_v18 = vld [vmem:[%s1962_s18 + $0x140] ss:$8 sps:$4 sm:$0xff]   ;;  %v1593_v19 = vld [vmem:[%s1962_s18 + $0x70] ss:$8 sps:$4 sm:$0xff]   ;;  %v1624_v20 = vld [vmem:[%s1962_s18 + $0x154] ss:$8 sps:$4 sm:$0xff]  }
  0x46   : > { %1011 = vmatprep.subr.bf16.mxu0 %v1606_v9  ;;  %v1597_v21 = vld [vmem:[%s1962_s18 + $0x84] ss:$8 sps:$4 sm:$0xff]   ;;  %v1626_v22 = vld [vmem:[%s1962_s18 + $0x150] ss:$8 sps:$4 sm:$0xff]   ;;  %v1599_v23 = vld [vmem:[%s1962_s18 + $0x80] ss:$8 sps:$4 sm:$0xff]  }
  0x47   : > { %899 = vmatpush1.bf16.msra.mxu1 %v1578_v63  ;;  %v1630_v24 = vld [vmem:[%s1962_s18 + $0x164] ss:$8 sps:$4 sm:$0xff]   ;;  %v1603_v25 = vld [vmem:[%s1962_s18 + $0x94] ss:$8 sps:$4 sm:$0xff]   ;;  %v1605_v26 = vld [vmem:[%s1962_s18 + $0x90] ss:$8 sps:$4 sm:$0xff]  }
  0x48   : > { %900 = vmatprep.subr.bf16.mxu1 %v1579_v0  ;;  %v1632_v27 = vld [vmem:[%s1962_s18 + $0x160] ss:$8 sps:$4 sm:$0xff]   ;;  %v1636_v28 = vld [vmem:[%s1962_s18 + $0x174] ss:$8 sps:$4 sm:$0xff]   ;;  %v1609_v29 = vld [vmem:[%s1962_s18 + $0xa4] ss:$8 sps:$4 sm:$0xff]  }
  0x49   : > { %1012 = vmatpush1.bf16.msra.mxu0 %v1608_v10  ;;  %v1638_v30 = vld [vmem:[%s1962_s18 + $0x170] ss:$8 sps:$4 sm:$0xff]   ;;  %v1611_v31 = vld [vmem:[%s1962_s18 + $0xa0] ss:$8 sps:$4 sm:$0xff]   ;;  %v1615_v32 = vld [vmem:[%s1962_s18 + $0xb4] ss:$8 sps:$4 sm:$0xff]  }
  0x4a   : > { %1013 = vmatprep.subr.bf16.mxu0 %v1612_v12  ;;  %v1617_v34 = vld [vmem:[%s1962_s18 + $0xb0] ss:$8 sps:$4 sm:$0xff]   ;;  %v1621_v35 = vld [vmem:[%s1962_s18 + $0xc4] ss:$8 sps:$4 sm:$0xff]   ;;  %v1623_v36 = vld [vmem:[%s1962_s18 + $0xc0] ss:$8 sps:$4 sm:$0xff]  }
  0x4b   : > { %901 = vmatpush1.bf16.msra.mxu1 %v1581_v1  ;;  %v1627_v37 = vld [vmem:[%s1962_s18 + $0xd4] ss:$8 sps:$4 sm:$0xff]   ;;  %v1629_v39 = vld [vmem:[%s1962_s18 + $0xd0] ss:$8 sps:$4 sm:$0xff]   ;;  %v1633_v40 = vld [vmem:[%s1962_s18 + $0xe4] ss:$8 sps:$4 sm:$0xff]  }
  0x4c   : > { %902 = vmatprep.subr.bf16.mxu1 %v1582_v4  ;;  %v1635_v41 = vld [vmem:[%s1962_s18 + $0xe0] ss:$8 sps:$4 sm:$0xff]   ;;  %v1639_v42 = vld [vmem:[%s1962_s18 + $0xf4] ss:$8 sps:$4 sm:$0xff]   ;;  %v1641_v44 = vld [vmem:[%s1962_s18 + $0xf0] ss:$8 sps:$4 sm:$0xff]  }
  0x4d   : > { %1014 = vmatpush1.bf16.msra.mxu0 %v1614_v14  ;;  %v1655_v52 = vld [vmem:[%s2203_s0 + $0x4c] ss:$12 sps:$4 sm:$0xff]   ;;  %v1657_v54 = vld [vmem:[%s2203_s0 + $0x48] ss:$12 sps:$4 sm:$0xff]   ;;  %v1659_v55 = vld [vmem:[%s2203_s0 + $0x64] ss:$12 sps:$4 sm:$0xff]  }
  0x4e   : > { %1015 = vmatprep.subr.bf16.mxu0 %v1618_v16  ;;  %v1662_v53 = vld [vmem:[%s2203_s0 + $0x80] ss:$12 sps:$4 sm:$0xff]   ;;  %v1666_v57 = vld [vmem:[%s2203_s0 + $0x98] ss:$12 sps:$4 sm:$0xff]   ;;  %v1663_v59 = vld [vmem:[%s2203_s0 + $0x7c] ss:$12 sps:$4 sm:$0xff]  }
  0x4f   : > { %903 = vmatpush1.bf16.msra.mxu1 %v1584_v7  ;;  %v1661_v58 = vld [vmem:[%s2203_s0 + $0x60] ss:$12 sps:$4 sm:$0xff]   ;;  %v1670_v60 = vld [vmem:[%s2203_s0 + $0xb0] ss:$12 sps:$4 sm:$0xff]   ;;  %v1665_v61 = vld [vmem:[%s2203_s0 + $0x78] ss:$12 sps:$4 sm:$0xff]  }
  0x50   : > { %904 = vmatprep.subr.bf16.mxu1 %v1585_v8  ;;  %v1667_v62 = vld [vmem:[%s2203_s0 + $0x94] ss:$12 sps:$4 sm:$0xff]   ;;  %v1671_v63 = vld [vmem:[%s2203_s0 + $0xac] ss:$12 sps:$4 sm:$0xff]   ;;  %s2146_s29 = scalar_lea.vmem [#allocation4], %s1430_s28  ;;  %s1510_s9 = sshll.u32 (%p1833_p5), %s1419_s15, 4 }
  0x51   : > { %1016 = vmatpush1.bf16.msra.mxu0 %v1620_v18  ;;  %v1673_v0 = vld [vmem:[%s2203_s0 + $0xa8] ss:$12 sps:$4 sm:$0xff]   ;;  %s1297_s21 = scalar_lea.vmem (%p1833_p5), %s2206_s3, %s1510_s9 }
  0x52   : > { %1017 = vmatprep.subr.bf16.mxu0 %v1624_v20 }
  0x53   : > { %905 = vmatpush1.bf16.msra.mxu1 %v1587_v11 }
  0x54   : > { %906 = vmatprep.subr.bf16.mxu1 %v1588_v13 }
  0x55   : > { %1018 = vmatpush1.bf16.msra.mxu0 %v1626_v22 }
  0x56   : > { %1019 = vmatprep.subr.bf16.mxu0 %v1630_v24 }
  0x57   : > { %907 = vmatpush1.bf16.msra.mxu1 %v1590_v15 }
  0x58   : > { %908 = vmatprep.subr.bf16.mxu1 %v1591_v17 }
  0x59   : > { %1020 = vmatpush1.bf16.msra.mxu0 %v1632_v27 }
  0x5a   : > { %1021 = vmatprep.subr.bf16.mxu0 %v1636_v28 }
  0x5b   : > { %909 = vmatpush1.bf16.msra.mxu1 %v1593_v19 }
  0x5c   : > { %910 = vmatprep.subr.bf16.mxu1 %v1597_v21 }
  0x5d   : > { %1022 = vmatpush1.bf16.msra.mxu0 %v1638_v30 }
  0x5f   : > { %911 = vmatpush1.bf16.msra.mxu1 %v1599_v23 }
  0x60   : > { %912 = vmatprep.subr.bf16.mxu1 %v1603_v25  ;;  %1040 = vmatmul.mubr.bf16.vlgmr.msra.gmra.mrb[0].mxu0 %v1642_v33 }
  0x61   : > { %1049 = vmatprep.mubr.bf16.mxu0 %v1778_v56 }
  0x63   : > { %913 = vmatpush1.bf16.msra.mxu1 %v1605_v26 }
  0x64   : > { %914 = vmatprep.subr.bf16.mxu1 %v1609_v29 }
  0x67   : > { %915 = vmatpush1.bf16.msra.mxu1 %v1611_v31 }
  0x68   : > { %916 = vmatprep.subr.bf16.mxu1 %v1615_v32  ;;  %1050 = vmatmul.mubr.bf16.gmra.mrb[4].mxu0 %v1646_v38 }
  0x69   : > { %1059 = vmatprep.mubr.bf16.mxu0 %v1778_v56 }
  0x6b   : > { %917 = vmatpush1.bf16.msra.mxu1 %v1617_v34 }
  0x6c   : > { %918 = vmatprep.subr.bf16.mxu1 %v1621_v35 }
  0x6f   : > { %919 = vmatpush1.bf16.msra.mxu1 %v1623_v36 }
  0x70   : > { %920 = vmatprep.subr.bf16.mxu1 %v1627_v37  ;;  %1060 = vmatmul.mubr.bf16.gmra.mrb[8].mxu0 %v1650_v43 }
  0x71   : > { %1069 = vmatprep.mubr.bf16.mxu0 %v1778_v56 }
  0x73   : > { %921 = vmatpush1.bf16.msra.mxu1 %v1629_v39 }
  0x74   : > { %922 = vmatprep.subr.bf16.mxu1 %v1633_v40 }
  0x77   : > { %923 = vmatpush1.bf16.msra.mxu1 %v1635_v41 }
  0x78   : > { %924 = vmatprep.subr.bf16.mxu1 %v1639_v42  ;;  %1070 = vmatmul.mubr.bf16.gmra.mrb[12].mxu0 %v1654_v47 }
  0x79   : > { %1079 = vmatprep.mubr.bf16.mxu0 %v1778_v56 }
  0x7b   : > { %925 = vmatpush1.bf16.msra.mxu1 %v1641_v44 }
  0x7e   : > { %927 = vmatmul.mubr.bf16.vlgmr.msra.gmra.mrb[0].mxu1 %v1643_v45 }
  0x7f   : > { %936 = vmatprep.mubr.bf16.mxu1 %v1647_v46 }
  0x80   : > { %1080 = vmatmul.mubr.bf16.gmra.mrb[16].mxu0 %v1658_v50 }
  0x81   : > { %1089 = vmatprep.mubr.bf16.mxu0 %v1778_v56 }
  0x86   : > { %937 = vmatmul.mubr.bf16.gmra.mrb[4].mxu1 %v1649_v48 }
  0x87   : > { %946 = vmatprep.mubr.bf16.mxu1 %v1651_v49 }
  0x88   : > { %1090 = vmatmul.mubr.bf16.gmra.mrb[20].mxu0 %v1662_v53 }
  0x89   : > { %1099 = vmatprep.mubr.bf16.mxu0 %v1778_v56 }
  0x8e   : > { %947 = vmatmul.mubr.bf16.gmra.mrb[8].mxu1 %v1653_v51 }
  0x8f   : > { %956 = vmatprep.mubr.bf16.mxu1 %v1655_v52 }
  0x90   : > { %1100 = vmatmul.mubr.bf16.gmra.mrb[24].mxu0 %v1666_v57 }
  0x91   : > { %1109 = vmatprep.mubr.bf16.mxu0 %v1778_v56  ;;  %v1669_v56 = vld [vmem:[%s2203_s0 + $0x90] ss:$12 sps:$4 sm:$0xff]  }
  0x96   : > { %957 = vmatmul.mubr.bf16.gmra.mrb[12].mxu1 %v1657_v54 }
  0x97   : > { %966 = vmatprep.mubr.bf16.mxu1 %v1659_v55 }
  0x98   : > { %1110 = vmatmul.mubr.bf16.gmra.mrb[28].mxu0 %v1670_v60 }
  0x9e   : > { %967 = vmatmul.mubr.bf16.gmra.mrb[16].mxu1 %v1661_v58 }
  0x9f   : > { %976 = vmatprep.mubr.bf16.mxu1 %v1663_v59 }
  0xa6   : > { %977 = vmatmul.mubr.bf16.gmra.mrb[20].mxu1 %v1665_v61 }
  0xa7   : > { %986 = vmatprep.mubr.bf16.mxu1 %v1667_v62 }
  0xae   : > { %987 = vmatmul.mubr.bf16.gmra.mrb[24].mxu1 %v1669_v56 }
  0xaf   : > { %996 = vmatprep.mubr.bf16.mxu1 %v1671_v63 }
  0xb6   : > { %997 = vmatmul.mubr.bf16.gmra.mrb[28].mxu1 %v1673_v0 }
 0x133   : > { %v1041_v1 = vpop.f32.mrb[0].mxu0 }
 0x134   : > { %v1043_v2 = vpop.f32.mrb[1].mxu0 }
 0x135   : > { %v1045_v3 = vpop.f32.mrb[2].mxu0 }
 0x136   : > { %v1047_v4 = vpop.f32.mrb[3].mxu0 }
 0x13b   : > { %v1051_v5 = vpop.f32.mrb[4].mxu0 }
 0x13c   : > { %v1053_v6 = vpop.f32.mrb[5].mxu0 }
 0x13d   : > { %v1055_v7 = vpop.f32.mrb[6].mxu0 }
 0x13e   : > { %v1057_v8 = vpop.f32.mrb[7].mxu0 }
 0x143   : > { %v1061_v9 = vpop.f32.mrb[8].mxu0 }
 0x144   : > { %v1063_v10 = vpop.f32.mrb[9].mxu0 }
 0x145   : > { %v1065_v11 = vpop.f32.mrb[10].mxu0 }
 0x146   : > { %v1067_v12 = vpop.f32.mrb[11].mxu0 }
 0x14b   : > { %v1071_v20 = vpop.f32.mrb[12].mxu0 }
 0x14c   : > { %v1073_v22 = vpop.f32.mrb[13].mxu0 }
 0x14d   : > { %v1075_v23 = vpop.f32.mrb[14].mxu0 }
 0x14e   : > { %v1077_v24 = vpop.f32.mrb[15].mxu0 }
 0x151   : > { %v928_v13 = vpop.f32.mrb[0].mxu1 }
 0x152   : > { %v1042_v14 = vadd.f32 %v1041_v1, %v928_v13  ;;  %v930_v15 = vpop.f32.mrb[1].mxu1 }
 0x153   : > { %v1044_v16 = vadd.f32 %v1043_v2, %v930_v15  ;;  %v932_v17 = vpop.f32.mrb[2].mxu1  ;;  %v1081_v32 = vpop.f32.mrb[16].mxu0 }
 0x154   : > { %v1046_v18 = vadd.f32 %v1045_v3, %v932_v17  ;;  %v934_v19 = vpop.f32.mrb[3].mxu1  ;;  %v1083_v34 = vpop.f32.mrb[17].mxu0  ;;  %v1120_v61 = vmul.f32 0.5, %v1042_v14 }
 0x155   : > { %v1048_v21 = vadd.f32 %v1047_v4, %v934_v19  ;;  %v1085_v35 = vpop.f32.mrb[18].mxu0  ;;  %v1121_v56 = vmul.f32 0.5, %v1044_v16 }
 0x156   : > { %v1087_v36 = vpop.f32.mrb[19].mxu0  ;;  %v1122_v63 = vmul.f32 0.5, %v1046_v18  ;;  %1674 = vtanh.f32 %v1120_v61 }
 0x157   : > { %v1123_v1 = vmul.f32 0.5, %v1048_v21  ;;  %1676 = vtanh.f32 %v1121_v56 }
 0x158   : > { %1678 = vtanh.f32 %v1122_v63 }
 0x159   : > { %v938_v25 = vpop.f32.mrb[4].mxu1  ;;  %1680 = vtanh.f32 %v1123_v1 }
 0x15a   : > { %v1052_v26 = vadd.f32 %v1051_v5, %v938_v25  ;;  %v940_v27 = vpop.f32.mrb[5].mxu1 }
 0x15b   : > { %v1054_v28 = vadd.f32 %v1053_v6, %v940_v27  ;;  %v942_v29 = vpop.f32.mrb[6].mxu1  ;;  %v1091_v44 = vpop.f32.mrb[20].mxu0 }
 0x15c   : > { %v1056_v30 = vadd.f32 %v1055_v7, %v942_v29  ;;  %v944_v31 = vpop.f32.mrb[7].mxu1  ;;  %v1093_v46 = vpop.f32.mrb[21].mxu0  ;;  %v1124_v4 = vmul.f32 0.5, %v1052_v26 }
 0x15d   : > { %v1058_v33 = vadd.f32 %v1057_v8, %v944_v31  ;;  %v1095_v47 = vpop.f32.mrb[22].mxu0  ;;  %v1125_v18 = vmul.f32 0.5, %v1054_v28 }
 0x15e   : > { %v1097_v48 = vpop.f32.mrb[23].mxu0  ;;  %1682 = vtanh.f32 %v1124_v4  ;;  %v1126_v19 = vmul.f32 0.5, %v1056_v30 }
 0x15f   : > { %v1127_v21 = vmul.f32 0.5, %v1058_v33 }
 0x161   : > { %v948_v37 = vpop.f32.mrb[8].mxu1 }
 0x162   : > { %v1062_v38 = vadd.f32 %v1061_v9, %v948_v37  ;;  %v950_v39 = vpop.f32.mrb[9].mxu1 }
 0x163   : > { %v1064_v40 = vadd.f32 %v1063_v10, %v950_v39  ;;  %v952_v41 = vpop.f32.mrb[10].mxu1  ;;  %v2088_v57 = vpop.f32.mrb[24].mxu0 }
 0x164   : > { %v1066_v42 = vadd.f32 %v1065_v11, %v952_v41  ;;  %v954_v43 = vpop.f32.mrb[11].mxu1  ;;  %v2090_v59 = vpop.f32.mrb[25].mxu0  ;;  %v1152_v7 = vmul.f32 0.5, %v1062_v38 }
 0x165   : > { %v1068_v45 = vadd.f32 %v1067_v12, %v954_v43  ;;  %v2092_v60 = vpop.f32.mrb[26].mxu0  ;;  %v1153_v11 = vmul.f32 0.5, %v1064_v40 }
 0x166   : > { %v2094_v62 = vpop.f32.mrb[27].mxu0  ;;  %v1154_v14 = vmul.f32 0.5, %v1066_v42  ;;  %1684 = vtanh.f32 %v1152_v7 }
 0x167   : > { %v1155_v16 = vmul.f32 0.5, %v1068_v45  ;;  %1686 = vtanh.f32 %v1153_v11 }
 0x168   : > { %1688 = vtanh.f32 %v1154_v14 }
 0x169   : > { %v958_v49 = vpop.f32.mrb[12].mxu1  ;;  %1690 = vtanh.f32 %v1155_v16 }
 0x16a   : > { %v1072_v50 = vadd.f32 %v1071_v20, %v958_v49  ;;  %v960_v51 = vpop.f32.mrb[13].mxu1  ;;  %1692 = vtanh.f32 %v1125_v18 }
 0x16b   : > { %v1074_v52 = vadd.f32 %v1073_v22, %v960_v51  ;;  %v962_v53 = vpop.f32.mrb[14].mxu1  ;;  %v2098_v10 = vpop.f32.mrb[28].mxu0  ;;  %1694 = vtanh.f32 %v1126_v19  ;;  %v1224_v19 = vld [vmem:[%s2128_s27] sm:$0xff] }
 0x16c   : > { %v1076_v54 = vadd.f32 %v1075_v23, %v962_v53  ;;  %v964_v55 = vpop.f32.mrb[15].mxu1  ;;  %v2102_v13 = vpop.f32.mrb[29].mxu0  ;;  %1696 = vtanh.f32 %v1127_v21 }
 0x16d   : > { %v1078_v58 = vadd.f32 %v1077_v24, %v964_v55  ;;  %v2104_v15 = vpop.f32.mrb[30].mxu0  ;;  %v1156_v24 = vmul.f32 0.5, %v1072_v50  ;;  %v1157_v27 = vmul.f32 0.5, %v1074_v52 }
 0x16e   : > { %v2106_v17 = vpop.f32.mrb[31].mxu0  ;;  %v1158_v28 = vmul.f32 0.5, %v1076_v54 }
 0x16f   : > { %v1159_v33 = vmul.f32 0.5, %v1078_v58  ;;  %1698 = vtanh.f32 %v1156_v24 }
 0x170   : > { %1700 = vtanh.f32 %v1157_v27 }
 0x171   : > { %v968_v0 = vpop.f32.mrb[16].mxu1  ;;  %1702 = vtanh.f32 %v1158_v28 }
 0x172   : > { %v1082_v2 = vadd.f32 %v1081_v32, %v968_v0  ;;  %v970_v3 = vpop.f32.mrb[17].mxu1  ;;  %v1675_v32 = vpop.eup %1674  ;;  %1704 = vtanh.f32 %v1159_v33  ;;  %v1227_v33 = vld [vmem:[%s2128_s27 + $0x18] sm:$0xff] }
 0x173   : > { %v1084_v5 = vadd.f32 %v1083_v34, %v970_v3  ;;  %v972_v6 = vpop.f32.mrb[18].mxu1  ;;  %v1677_v34 = vpop.eup %1676 }
 0x174   : > { %v2096_v8 = vadd.f32 %v1085_v35, %v972_v6  ;;  %v974_v9 = vpop.f32.mrb[19].mxu1  ;;  %v1679_v35 = vpop.eup %1678  ;;  %v1137_v45 = vadd.f32 1.0, %v1677_v34 }
 0x175   : > { %v2100_v12 = vadd.f32 %v1087_v36, %v974_v9  ;;  %v1184_v36 = vmul.f32 0.5, %v1082_v2  ;;  %v1681_v37 = vpop.eup %1680  ;;  %v1138_v49 = vadd.f32 1.0, %v1679_v35  ;;  %v1185_v50 = vmul.f32 0.5, %v1084_v5 }
 0x176   : > { %v1683_v38 = vpop.eup %1682  ;;  %v1139_v54 = vadd.f32 1.0, %v1681_v37  ;;  %v1186_v55 = vmul.f32 0.5, %v2096_v8  ;;  %v1145_v5 = vmul.f32 0.5, %v1137_v45 }
 0x177   : > { %v1685_v40 = vpop.eup %1684  ;;  %1706 = vtanh.f32 %v1184_v36  ;;  %v1140_v18 = vadd.f32 1.0, %v1683_v38 }
 0x178   : > { %v1687_v43 = vpop.eup %1686  ;;  %v1168_v61 = vadd.f32 1.0, %v1685_v40  ;;  %v1147_v6 = vmul.f32 0.5, %v1139_v54 }
 0x179   : > { %v978_v20 = vpop.f32.mrb[20].mxu1  ;;  %v1169_v56 = vadd.f32 1.0, %v1687_v43 }
 0x17a   : > { %v1092_v22 = vadd.f32 %v1091_v44, %v978_v20  ;;  %v980_v23 = vpop.f32.mrb[21].mxu1  ;;  %v1136_v44 = vadd.f32 1.0, %v1675_v32  ;;  %v1176_v9 = vmul.f32 0.5, %v1168_v61  ;;  %v1225_v20 = vld [vmem:[%s2128_s27 + $0x8] sm:$0xff] }
 0x17b   : > { %v2108_v25 = vadd.f32 %v1093_v46, %v980_v23  ;;  %v982_v26 = vpop.f32.mrb[22].mxu1  ;;  %v1177_v11 = vmul.f32 0.5, %v1169_v56 }
 0x17c   : > { %v2110_v29 = vadd.f32 %v1095_v47, %v982_v26  ;;  %v984_v31 = vpop.f32.mrb[23].mxu1  ;;  %v1188_v1 = vmul.f32 0.5, %v1092_v22  ;;  %v1144_v2 = vmul.f32 0.5, %v1136_v44  ;;  %v1232_v37 = vmul.f32 %v1224_v19, %v1176_v9 }
 0x17d   : > { %v2112_v30 = vadd.f32 %v1097_v48, %v984_v31  ;;  %v1689_v48 = vpop.eup %1688  ;;  %v1189_v27 = vmul.f32 0.5, %v2108_v25  ;;  %v1233_v38 = vmul.f32 %v1225_v20, %v1177_v11 }
 0x17e   : > { %v1691_v53 = vpop.eup %1690  ;;  %v1170_v0 = vadd.f32 1.0, %v1689_v48  ;;  %v1190_v35 = vmul.f32 0.5, %v2110_v29 }
 0x17f   : > { %v1693_v58 = vpop.eup %1692  ;;  %v1171_v3 = vadd.f32 1.0, %v1691_v53 }
 0x180   : > { %v2121_v63 = vpop.eup %1694  ;;  %v1178_v21 = vmul.f32 0.5, %v1170_v0  ;;  %v1141_v34 = vadd.f32 1.0, %v1693_v58  ;;  %v1228_v58 = vld [vmem:[%s2128_s27 + $0x20] sm:$0xff]  ;;  %v1229_v0 = vld [vmem:[%s2128_s27 + $0x28] sm:$0xff] }
 0x181   : > { %v988_v39 = vpop.f32.mrb[24].mxu1  ;;  %v1179_v26 = vmul.f32 0.5, %v1171_v3 }
 0x182   : > { %v1102_v41 = vadd.f32 %v2088_v57, %v988_v39  ;;  %v990_v42 = vpop.f32.mrb[25].mxu1  ;;  %v1191_v39 = vmul.f32 0.5, %v2112_v30  ;;  %v1149_v3 = vmul.f32 0.5, %v1141_v34 }
 0x183   : > { %v1104_v46 = vadd.f32 %v2090_v59, %v990_v42  ;;  %v992_v47 = vpop.f32.mrb[26].mxu1  ;;  %v1187_v59 = vmul.f32 0.5, %v2100_v12  ;;  %v1235_v43 = vmul.f32 %v1227_v33, %v1179_v26 }
 0x184   : > { %1708 = vtanh.f32 %v1102_v41  ;;  %v1106_v51 = vadd.f32 %v2092_v60, %v992_v47  ;;  %v994_v52 = vpop.f32.mrb[27].mxu1  ;;  %v2123_v60 = vpop.eup %1696 }
 0x185   : > { %1710 = vtanh.f32 %v1104_v46  ;;  %v1108_v57 = vadd.f32 %v2094_v62, %v994_v52  ;;  %v1699_v4 = vpop.eup %1698  ;;  %v1146_v62 = vmul.f32 0.5, %v1138_v49  ;;  %v1142_v52 = vadd.f32 1.0, %v2121_v63 }
 0x186   : > { %1712 = vtanh.f32 %v1106_v51  ;;  %v1701_v8 = vpop.eup %1700  ;;  %v1148_v63 = vmul.f32 0.5, %v1140_v18 }
 0x187   : > { %1714 = vtanh.f32 %v1108_v57  ;;  %v1703_v16 = vpop.eup %1702  ;;  %v1173_v44 = vadd.f32 1.0, %v1701_v8  ;;  %v1143_v57 = vadd.f32 1.0, %v2123_v60 }
 0x188   : > { %1716 = vtanh.f32 %v1185_v50  ;;  %v1705_v24 = vpop.eup %1704  ;;  %v1174_v46 = vadd.f32 1.0, %v1703_v16 }
 0x189   : > { %1718 = vtanh.f32 %v1186_v55  ;;  %v998_v7 = vpop.f32.mrb[28].mxu1  ;;  %v2136_v28 = vpop.eup %1706  ;;  %v1175_v30 = vadd.f32 1.0, %v1705_v24  ;;  %v1181_v61 = vmul.f32 0.5, %v1173_v44  ;;  %v1151_v11 = vmul.f32 0.5, %v1143_v57 }
 0x18a   : > { %1720 = vtanh.f32 %v1187_v59  ;;  %v1112_v12 = vadd.f32 %v2098_v10, %v998_v7  ;;  %v1000_v14 = vpop.f32.mrb[29].mxu1  ;;  %v1226_v10 = vld [vmem:[%s2128_s27 + $0x10] sm:$0xff]  ;;  %v1231_v7 = vld [vmem:[%s2128_s27 + $0x38] sm:$0xff] }
 0x18b   : > { %1722 = vtanh.f32 %v1188_v1  ;;  %v1114_v22 = vadd.f32 %v2102_v13, %v1000_v14  ;;  %v1002_v23 = vpop.f32.mrb[30].mxu1  ;;  %v1234_v40 = vmul.f32 %v1226_v10, %v1178_v21  ;;  %v1182_v1 = vmul.f32 0.5, %v1174_v46 }
 0x18c   : > { %1724 = vtanh.f32 %v1112_v12  ;;  %v1116_v31 = vadd.f32 %v2104_v15, %v1002_v23  ;;  %v1004_v32 = vpop.f32.mrb[31].mxu1  ;;  %v1172_v15 = vadd.f32 1.0, %v1699_v4  ;;  %v1230_v4 = vld [vmem:[%s2128_s27 + $0x30] sm:$0xff]  ;;  %v1237_v12 = vmul.f32 %v1229_v0, %v1181_v61 }
 0x18d   : > { %1726 = vtanh.f32 %v1114_v22  ;;  %v1118_v13 = vadd.f32 %v2106_v17, %v1004_v32  ;;  %v1200_v14 = vadd.f32 1.0, %v2136_v28  ;;  %v1238_v19 = vmul.f32 %v1230_v4, %v1182_v1 }
 0x18e   : > { %v1709_v36 = vpop.eup %1708  ;;  %1728 = vtanh.f32 %v1116_v31  ;;  %v1180_v53 = vmul.f32 0.5, %v1172_v15 }
 0x18f   : > { %v1711_v25 = vpop.eup %1710  ;;  %v1240_v41 = vmul.f32 %v1709_v36, %v1144_v2  ;;  %1730 = vtanh.f32 %v1118_v13  ;;  %v1208_v33 = vmul.f32 0.5, %v1200_v14 }
 0x190   : > { %v1713_v42 = vpop.eup %1712  ;;  %1732 = vtanh.f32 %v1189_v27  ;;  %v1241_v29 = vmul.f32 %v1711_v25, %v1145_v5  ;;  %v1183_v5 = vmul.f32 0.5, %v1175_v30 }
 0x191   : > { %v1715_v45 = vpop.eup %1714  ;;  %1734 = vtanh.f32 %v1190_v35  ;;  %v1248_v17 = vadd.f32 %v1240_v41, %v1232_v37  ;;  %v1242_v47 = vmul.f32 %v1713_v42, %v1146_v62  ;;  %v1150_v62 = vmul.f32 0.5, %v1142_v52 }
 0x192   : > { %v1717_v48 = vpop.eup %1716  ;;  %1736 = vtanh.f32 %v1191_v39  ;;  %v1249_v49 = vadd.f32 %v1241_v29, %v1233_v38  ;;  %v1243_v50 = vmul.f32 %v1715_v45, %v1147_v6  ;;  %v1236_v6 = vmul.f32 %v1228_v58, %v1180_v53 }
 0x193   : > { %v1719_v51 = vpop.eup %1718  ;;  %1738 = vtanh.f32 %v1248_v17  ;;  %1280 = vst [vmem:[%s2146_s29 + $0x40] sm:$0xff] %v1248_v17  ;;  %v1250_v54 = vadd.f32 %v1242_v47, %v1234_v40  ;;  %v1201_v20 = vadd.f32 1.0, %v1717_v48  ;;  %v1239_v24 = vmul.f32 %v1231_v7, %v1183_v5 }
 0x194   : > { %v1721_v55 = vpop.eup %1720  ;;  %1740 = vtanh.f32 %v1249_v49  ;;  %1281 = vst [vmem:[%s2146_s29 + $0x48] sm:$0xff] %v1249_v49  ;;  %v1251_v56 = vadd.f32 %v1243_v50, %v1235_v43  ;;  %v1202_v10 = vadd.f32 1.0, %v1719_v51 }
 0x195   : > { %v1723_v59 = vpop.eup %1722  ;;  %1742 = vtanh.f32 %v1250_v54  ;;  %1282 = vst [vmem:[%s2146_s29 + $0x50] sm:$0xff] %v1250_v54  ;;  %v1203_v32 = vadd.f32 1.0, %v1721_v55  ;;  %v1209_v36 = vmul.f32 0.5, %v1201_v20 }
 0x196   : > { %v1725_v2 = vpop.eup %1724  ;;  %1744 = vtanh.f32 %v1251_v56  ;;  %1283 = vst [vmem:[%s2146_s29 + $0x58] sm:$0xff] %v1251_v56  ;;  %v1210_v38 = vmul.f32 0.5, %v1202_v10  ;;  %v1204_v42 = vadd.f32 1.0, %v1723_v59 }
 0x197   : > { %v1727_v60 = vpop.eup %1726  ;;  %v1244_v8 = vmul.f32 %v1725_v2, %v1148_v63  ;;  %v1211_v40 = vmul.f32 0.5, %v1203_v32 }
 0x198   : > { %v1729_v9 = vpop.eup %1728  ;;  %v1245_v16 = vmul.f32 %v1727_v60, %v1149_v3  ;;  %v1212_v17 = vmul.f32 0.5, %v1204_v42 }
 0x199   : > { %v1731_v18 = vpop.eup %1730  ;;  %v1252_v21 = vadd.f32 %v1244_v8, %v1236_v6  ;;  %v1246_v22 = vmul.f32 %v1729_v9, %v1150_v62 }
 0x19a   : > { %v1733_v23 = vpop.eup %1732  ;;  %v1253_v26 = vadd.f32 %v1245_v16, %v1237_v12  ;;  %v1247_v27 = vmul.f32 %v1731_v18, %v1151_v11  ;;  %v1326_v3 = vld [vmem:[%s2146_s29 + $0x40] sm:$0xff] (%p1833_p5) }
 0x19b   : > { %v1735_v31 = vpop.eup %1734  ;;  %1746 = vtanh.f32 %v1252_v21  ;;  %1284 = vst [vmem:[%s2146_s29 + $0x60] sm:$0xff] %v1252_v21  ;;  %v1254_v34 = vadd.f32 %v1246_v22, %v1238_v19  ;;  %v1205_v44 = vadd.f32 1.0, %v1733_v23  ;;  %1327 = vst [vmem:[%s1297_s21 + $0x80] sm:$0xff] (%p1833_p5), %v1326_v3  ;;  %v1328_v4 = vld [vmem:[%s2146_s29 + $0x48] sm:$0xff] (%p1833_p5) }
 0x19c   : > { %v1737_v28 = vpop.eup %1736  ;;  %1748 = vtanh.f32 %v1253_v26  ;;  %1285 = vst [vmem:[%s2146_s29 + $0x68] sm:$0xff] %v1253_v26  ;;  %v1255_v35 = vadd.f32 %v1247_v27, %v1239_v24  ;;  %v1206_v45 = vadd.f32 1.0, %v1735_v31  ;;  %v1330_v5 = vld [vmem:[%s2146_s29 + $0x50] sm:$0xff] (%p1833_p5)  ;;  %1329 = vst [vmem:[%s1297_s21 + $0x88] sm:$0xff] (%p1833_p5), %v1328_v4 }
 0x19d   : > { %v1739_v13 = vpop.eup %1738  ;;  %1750 = vtanh.f32 %v1254_v34  ;;  %1286 = vst [vmem:[%s2146_s29 + $0x70] sm:$0xff] %v1254_v34  ;;  %v1207_v46 = vadd.f32 1.0, %v1737_v28  ;;  %v1213_v48 = vmul.f32 0.5, %v1205_v44  ;;  %v1332_v60 = vld [vmem:[%s2146_s29 + $0x58] sm:$0xff] (%p1833_p5)  ;;  %1331 = vst [vmem:[%s1297_s21 + $0xa0] sm:$0xff] (%p1833_p5), %v1330_v5 }
 0x19e   : > { %v1741_v37 = vpop.eup %1740  ;;  %v1264_v39 = vmul.f32 %v1739_v13, %v1208_v33  ;;  %1752 = vtanh.f32 %v1255_v35  ;;  %1287 = vst [vmem:[%s2146_s29 + $0x78] sm:$0xff] %v1255_v35  ;;  %v1214_v49 = vmul.f32 0.5, %v1206_v45  ;;  %1333 = vst [vmem:[%s1297_s21 + $0xa8] sm:$0xff] (%p1833_p5), %v1332_v60 }
 0x19f   : > { %v1743_v25 = vpop.eup %1742  ;;  %v1265_v15 = vmul.f32 %v1741_v37, %v1209_v36  ;;  %v1215_v52 = vmul.f32 0.5, %v1207_v46 }
 0x1a0   : > { %v1745_v41 = vpop.eup %1744  ;;  %1272 = vst [vmem:[%s2146_s29] sm:$0xff] %v1264_v39  ;;  %v1266_v43 = vmul.f32 %v1743_v25, %v1210_v38 }
 0x1a1   : > { %1273 = vst [vmem:[%s2146_s29 + $0x8] sm:$0xff] %v1265_v15  ;;  %v1267_v29 = vmul.f32 %v1745_v41, %v1211_v40 }
 0x1a2   : > { %1274 = vst [vmem:[%s2146_s29 + $0x10] sm:$0xff] %v1266_v43  ;;  %v1334_v62 = vld [vmem:[%s2146_s29 + $0x60] sm:$0xff] (%p1833_p5) }
 0x1a3   : > { %1275 = vst [vmem:[%s2146_s29 + $0x18] sm:$0xff] %v1267_v29  ;;  %v1336_v6 = vld [vmem:[%s2146_s29 + $0x68] sm:$0xff] (%p1833_p5)  ;;  %1335 = vst [vmem:[%s1297_s21 + $0xc0] sm:$0xff] (%p1833_p5), %v1334_v62 }
 0x1a4   : > { %v1338_v7 = vld [vmem:[%s2146_s29 + $0x70] sm:$0xff] (%p1833_p5)  ;;  %1337 = vst [vmem:[%s1297_s21 + $0xc8] sm:$0xff] (%p1833_p5), %v1336_v6 }
 0x1a5   : > { %v1747_v47 = vpop.eup %1746  ;;  %1294 = sbr.rel (!%p1833_p5) target bundleno = 436 (0x1b4), region = 97  ;;  %1339 = vst [vmem:[%s1297_s21 + $0xe0] sm:$0xff] (%p1833_p5), %v1338_v7  ;;  %v1340_v8 = vld [vmem:[%s2146_s29 + $0x78] sm:$0xff] (%p1833_p5) }
 0x1a6   : > { %v1749_v30 = vpop.eup %1748  ;;  %v1268_v50 = vmul.f32 %v1747_v47, %v1212_v17  ;;  %1341 = vst [vmem:[%s1297_s21 + $0xe8] sm:$0xff] (%p1833_p5), %v1340_v8 }
 0x1a7   : > { %v1751_v51 = vpop.eup %1750  ;;  %v1269_v53 = vmul.f32 %v1749_v30, %v1213_v48  ;;  %v1310_v58 = vld [vmem:[%s2146_s29] sm:$0xff] (%p1833_p5) }
 0x1a8   : > { %v1753_v54 = vpop.eup %1752  ;;  %1276 = vst [vmem:[%s2146_s29 + $0x20] sm:$0xff] %v1268_v50  ;;  %v1270_v55 = vmul.f32 %v1751_v51, %v1214_v49  ;;  %v1312_v61 = vld [vmem:[%s2146_s29 + $0x8] sm:$0xff] (%p1833_p5)  ;;  %1311 = vst [vmem:[%s1297_s21] sm:$0xff] (%p1833_p5), %v1310_v58 }
 0x1a9   : > { %1277 = vst [vmem:[%s2146_s29 + $0x28] sm:$0xff] %v1269_v53  ;;  %v1271_v57 = vmul.f32 %v1753_v54, %v1215_v52  ;;  %v1314_v56 = vld [vmem:[%s2146_s29 + $0x10] sm:$0xff] (%p1833_p5)  ;;  %1313 = vst [vmem:[%s1297_s21 + $0x8] sm:$0xff] (%p1833_p5), %v1312_v61 }
 0x1aa   : > { %1278 = vst [vmem:[%s2146_s29 + $0x30] sm:$0xff] %v1270_v55  ;;  %v1316_v59 = vld [vmem:[%s2146_s29 + $0x18] sm:$0xff] (%p1833_p5)  ;;  %1315 = vst [vmem:[%s1297_s21 + $0x20] sm:$0xff] (%p1833_p5), %v1314_v56 }
 0x1ab   : > { %1279 = vst [vmem:[%s2146_s29 + $0x38] sm:$0xff] %v1271_v57  ;;  %1317 = vst [vmem:[%s1297_s21 + $0x28] sm:$0xff] (%p1833_p5), %v1316_v59 }
 0x1af   : > { %v1318_v63 = vld [vmem:[%s2146_s29 + $0x20] sm:$0xff] }
 0x1b0   : > { %v1320_v0 = vld [vmem:[%s2146_s29 + $0x28] sm:$0xff]  ;;  %1319 = vst [vmem:[%s1297_s21 + $0x40] sm:$0xff] %v1318_v63 }
 0x1b1   : > { %1321 = vst [vmem:[%s1297_s21 + $0x48] sm:$0xff] %v1320_v0  ;;  %v1322_v1 = vld [vmem:[%s2146_s29 + $0x30] sm:$0xff] }
 0x1b2   : > { %v1324_v2 = vld [vmem:[%s2146_s29 + $0x38] sm:$0xff]  ;;  %1323 = vst [vmem:[%s1297_s21 + $0x60] sm:$0xff] %v1322_v1 }
 0x1b3   : > { %1325 = vst [vmem:[%s1297_s21 + $0x68] sm:$0xff] %v1324_v2 }
 0x1b4 PF: > { %p10_p10 = scmp.ge.s32.totalorder %s1816_s16, 4   ;;  %s2209_s12 = smov %s1772_s13 }
 0x1b5   : > { %s2210_s13 = smov %s1827_s19  ;;  %s2211_s14 = smov %s1816_s16 }
 0x1b6   :  { %12 = sbr.rel (!%p10_p10) target bundleno = 2 (0x2), region = 159 }

</bundles_post_ra>
